<compile_context>
chip_gen: v5e
topology: v5e:2x2
jax: 0.10.0
libtpu: 0.0.40
codegen_flags: <defaults>
</compile_context>

<pallas_src>
import math

import jax
import jax.numpy as jnp
from jax import lax
from jax.experimental import pallas as pl
from jax.experimental.pallas import tpu as pltpu


def _round_up(x, m):
    return ((x + m - 1) // m) * m


# -----------------------------------------------------------------------------
# Pallas kernel 1: masked low-rank weight reconstruction (per kernel tap).
# Emits W^T per tap so the conv weight is a straight reshape downstream.
# -----------------------------------------------------------------------------
def masked_weight_kernel(a_ref, ma_ref, b_ref, mb_ref, o_ref):
    """o = (a * ma) @ (b * mb)   for one kernel tap.

    a_ref  : (in_f, R)   lr_weight1 pre-transposed/flattened, R = nc*rpc
    ma_ref : (in_f, R)   mask1 expanded over rank-per-component
    b_ref  : (R, out_f)  lr_weight2 pre-transposed/flattened
    mb_ref : (R, out_f)  mask2 expanded over rank-per-component
    o_ref  : (in_f, out_f)  == W^T for this tap
    """
    lhs = a_ref[...] * ma_ref[...]
    rhs = b_ref[...] * mb_ref[...]
    o_ref[...] = jnp.dot(lhs, rhs, preferred_element_type=jnp.float32)


def build_masked_conv_weight_t(lr1_all, lr2_all, m1_all, m2_all):
    """Returns stacked per-tap transposed weights: (nm, in_f, out_f).

    .reshape(kh*kw*in_f, out_f) is directly the im2col weight with rows ordered
    (ky, kx, c) and OC on the lane (last) dimension — no transposes needed.
    """
    nm, nc, rpc, in_f = lr1_all.shape
    out_f = lr2_all.shape[2]
    R = nc * rpc

    # Layout plumbing on tiny parameter tensors (once per forward, plain XLA):
    a_all = jnp.transpose(lr1_all, (0, 3, 1, 2)).reshape(nm, in_f, R)
    ma_all = jnp.repeat(jnp.transpose(m1_all, (0, 2, 1)), rpc, axis=-1)
    b_all = jnp.transpose(lr2_all, (0, 1, 3, 2)).reshape(nm, R, out_f)
    mb_all = jnp.repeat(m2_all, rpc, axis=1)

    wT_all = pl.pallas_call(
        masked_weight_kernel,
        out_shape=jax.ShapeDtypeStruct((nm, in_f, out_f), jnp.float32),
        grid=(nm,),
        in_specs=[
            pl.BlockSpec((None, in_f, R), lambda i: (i, 0, 0)),
            pl.BlockSpec((None, in_f, R), lambda i: (i, 0, 0)),
            pl.BlockSpec((None, R, out_f), lambda i: (i, 0, 0)),
            pl.BlockSpec((None, R, out_f), lambda i: (i, 0, 0)),
        ],
        out_specs=pl.BlockSpec((None, in_f, out_f), lambda i: (i, 0, 0)),
        # taps are independent -> parallel (sharded across TCs on v7x, no-op on
        # single-TC v5e/v6e).
        compiler_params=pltpu.CompilerParams(dimension_semantics=("parallel",)),
    )(a_all, ma_all, b_all, mb_all)
    return wT_all


# -----------------------------------------------------------------------------
# Pallas kernel 2: im2col conv matmul + bias.
# Grid (M tiles, OC tiles, K tiles); K is the reduction ("arbitrary") axis with
# an fp32 VMEM accumulator; inputs are bf16 (MXU-native), accumulate in fp32.
# -----------------------------------------------------------------------------
def conv_matmul_kernel(p_ref, w_ref, b_ref, o_ref, acc_ref):
    @pl.when(pl.program_id(2) == 0)
    def _():
        acc_ref[...] = jnp.zeros_like(acc_ref)

    acc_ref[...] += jnp.dot(p_ref[...], w_ref[...],
                            preferred_element_type=jnp.float32)

    @pl.when(pl.program_id(2) == pl.num_programs(2) - 1)
    def _():
        o_ref[...] = acc_ref[...] + b_ref[...]


def conv2d_im2col_pallas(x_nchw, w2d, bias, stride, padding, dilation, kh, kw,
                         compute_dtype=jnp.bfloat16):
    """x: (B, IC, H, W), w2d: (KH*KW*IC, OC) rows ordered (ky, kx, c)."""
    # TODO(synk): grouped conv (groups > 1) not implemented; module default is 1.
    B, IC, H, W = x_nchw.shape
    K, OC = w2d.shape
    sh, sw = stride
    ph, pw = padding
    dh, dw = dilation
    OH = (H + 2 * ph - dh * (kh - 1) - 1) // sh + 1
    OW = (W + 2 * pw - dw * (kw - 1) - 1) // sw + 1

    x = jnp.transpose(x_nchw, (0, 2, 3, 1))                       # NHWC
    x = jnp.pad(x, ((0, 0), (ph, ph), (pw, pw), (0, 0)))

    # TODO(synk): im2col is materialized by XLA here (KH*KW x HBM inflation);
    # fusing it into the Pallas grid (shifted (TM, IC) tiles of the padded NHWC
    # input per tap) needs element-offset / manual-DMA indexing.
    taps = []
    for ky in range(kh):
        for kx in range(kw):
            taps.append(
                x[:, ky * dh: ky * dh + (OH - 1) * sh + 1: sh,
                     kx * dw: kx * dw + (OW - 1) * sw + 1: sw, :])
    patches = jnp.stack(taps, axis=3).reshape(B * OH * OW, K)

    M = B * OH * OW
    TM, TN, TK = 512, 128, 128          # large M tile; lane-dense OC; aligned K
    M_pad = _round_up(M, TM)
    K_pad = _round_up(K, TK)
    OC_pad = _round_up(OC, TN)

    # Zero-pad K / OC once in the wrapper: keeps every MXU op full-width and the
    # output stores lane-dense (unmasked vst). bf16 inputs, fp32 accumulate.
    patches = jnp.pad(patches, ((0, M_pad - M), (0, K_pad - K))).astype(compute_dtype)
    w_p = jnp.pad(w2d, ((0, K_pad - K), (0, OC_pad - OC))).astype(compute_dtype)
    b_p = jnp.pad(bias.astype(jnp.float32), (0, OC_pad - OC)).reshape(1, OC_pad)

    grid = (M_pad // TM, OC_pad // TN, K_pad // TK)
    # VMEM footprint per step (double-buffered) is well under the scoped default
    # on all of v5e/v6e/v7x for these tile sizes; raise vmem_limit_bytes in
    # CompilerParams if TM/TK/TN are grown for big layers.
    out = pl.pallas_call(
        conv_matmul_kernel,
        out_shape=jax.ShapeDtypeStruct((M_pad, OC_pad), jnp.float32),
        grid=grid,
        in_specs=[
            pl.BlockSpec((TM, TK), lambda i, j, k: (i, k)),
            pl.BlockSpec((TK, TN), lambda i, j, k: (k, j)),
            pl.BlockSpec((1, TN), lambda i, j, k: (0, j)),
        ],
        out_specs=pl.BlockSpec((TM, TN), lambda i, j, k: (i, j)),
        scratch_shapes=[pltpu.VMEM((TM, TN), jnp.float32)],
        compiler_params=pltpu.CompilerParams(
            dimension_semantics=("parallel", "parallel", "arbitrary")),
    )(patches, w_p, b_p)

    out = out[:M, :OC].reshape(B, OH, OW, OC).transpose(0, 3, 1, 2)  # NCHW
    return out


# -----------------------------------------------------------------------------
# Gaudi mask (GaudiGBLR.get_mask / get_width, eval mode) — plain JAX glue.
# -----------------------------------------------------------------------------
def gaudi_mask(widths, locations, n, sigma):
    """widths, locations: (..., nc)  ->  mask (..., nc, n)."""
    w = jnp.round(widths * n) / n                       # get_width STE forward value
    w = jnp.where(jnp.abs(w) > 1.0 / n, w, 0.0)         # F.hardshrink(w, 1/n) (eval)
    loc = jnp.round(locations * n) / n                  # location STE forward value
    freq = jnp.arange(n // 2 + 1, dtype=jnp.float32)
    w_ = w[..., None]
    loc_ = loc[..., None] * (2.0 * jnp.pi)
    exp_imag = -freq * loc_ + jnp.pi * freq * (1.0 / n - w_)
    exp_real = -0.5 / (sigma ** 2) * freq ** 2
    amp = w_ * jnp.sinc(freq * w_) / jnp.sinc(freq / n) * jnp.exp(exp_real)
    spec = amp * (jnp.cos(exp_imag) + 1j * jnp.sin(exp_imag))
    # TODO(synk): irfft has no Pallas primitive; done with jnp.fft in the wrapper.
    mask = jnp.fft.irfft(spec, n=n, norm="forward")     # real, (..., nc, n)
    mask = jnp.where(jnp.abs(mask) < 0.001, 0.0, mask)  # eval-mode thresholding
    return mask.astype(jnp.float32)


# -----------------------------------------------------------------------------
# Deterministic parameter initialization (mirrors GaudiGBLR.__init__ / Conv2d)
# -----------------------------------------------------------------------------
def init_gaudi_conv_params(key, nm, nc, rpc, in_f, out_f, kh, kw):
    # TODO(synk): init='lr' uses an SVD projection of the original conv weight
    # (low_rank_project); we use GaudiGBLR.set_weights' uniform init instead.
    gain = math.sqrt(2.0 / (1.0 + 5.0))                 # leaky_relu gain, a=sqrt(5)
    b1 = math.sqrt(3.0) * gain / math.sqrt(in_f)        # fan_in of lr_weight1
    b2 = math.sqrt(3.0) * gain / math.sqrt(rpc)         # fan_in of lr_weight2
    k1, k2, k3, k4 = jax.random.split(key, 4)
    lr1_all = jax.random.uniform(k1, (nm, nc, rpc, in_f), jnp.float32, -b1, b1)
    lr2_all = jax.random.uniform(k2, (nm, nc, out_f, rpc), jnp.float32, -b2, b2)

    # widths: 'splr' init from reset_mask_parameters
    saving = (nc * rpc * in_f + nc * out_f * rpc) / float(in_f * out_f)
    ratio = 1.0 / saving
    nnz = int(nc * ratio * 0.5)
    short = 0.5 * ratio / (1.0 - 0.5 * ratio)
    wrow = jnp.concatenate(
        [jnp.ones((nnz,), jnp.float32), jnp.full((nc - nnz,), short, jnp.float32)])
    widths_all = jnp.broadcast_to(wrow, (nm, 2, nc)).astype(jnp.float32)

    # locations: 'splr' init falls through to uniform(0, 1)
    locs_all = jax.random.uniform(k3, (nm, 2, nc), jnp.float32, 0.0, 1.0)

    # conv bias (taken from the wrapped Conv2d): default PyTorch Conv2d init
    fan_in = in_f * kh * kw
    bb = 1.0 / math.sqrt(fan_in)
    bias = jax.random.uniform(k4, (out_f,), jnp.float32, -bb, bb)
    return lr1_all, lr2_all, widths_all, locs_all, bias


# -----------------------------------------------------------------------------
# Forward pass: GaudiGBLRConv2d.forward
# -----------------------------------------------------------------------------
def gaudi_gblr_conv2d_forward(x, params, cfg, unified_mask=False):
    lr1_all, lr2_all, widths_all, locs_all, bias = params
    in_f, out_f = cfg["in_f"], cfg["out_f"]
    kh, kw = cfg["kh"], cfg["kw"]
    m1_all = gaudi_mask(widths_all[:, 0, :], locs_all[:, 0, :], in_f, cfg["sigma"])
    m2_all = gaudi_mask(widths_all[:, 1, :], locs_all[:, 1, :], out_f, cfg["sigma"])
    if unified_mask:
        m1_all = jnp.broadcast_to(m1_all[:1], m1_all.shape)
        m2_all = jnp.broadcast_to(m2_all[:1], m2_all.shape)

    wT_all = build_masked_conv_weight_t(lr1_all, lr2_all, m1_all, m2_all)
    w2d = wT_all.reshape(kh * kw * in_f, out_f)   # (ky, kx, c) rows, OC on lanes
    out = conv2d_im2col_pallas(x, w2d, bias, cfg["stride"], cfg["padding"],
                               cfg["dilation"], kh, kw)
    return out, wT_all, (m1_all, m2_all)


if __name__ == "__main__":
    # Small config consistent with the module: Conv2d(4 -> 8, 3x3, pad=1),
    # GaudiGBLR per tap with rank_per_component=2, num_components=2, sigma=100.
    B, IC, H, W = 2, 4, 16, 16
    OC, KH, KW = 8, 3, 3
    cfg = dict(in_f=IC, out_f=OC, kh=KH, kw=KW, sigma=100.0,
               stride=(1, 1), padding=(1, 1), dilation=(1, 1))
    NC, RPC = 2, 2
    NM = KH * KW

    key = jax.random.PRNGKey(0)
    kx, kp = jax.random.split(key)
    x = jax.random.normal(kx, (B, IC, H, W), jnp.float32)
    params = init_gaudi_conv_params(kp, NM, NC, RPC, IC, OC, KH, KW)

    out, wT_all, (m1_all, m2_all) = gaudi_gblr_conv2d_forward(x, params, cfg)
    out = jax.block_until_ready(out)
    assert out.shape == (B, OC, H, W)

    # ---- reference checks (plain JAX / XLA) ----
    lr1_all, lr2_all, _, _, bias = params

    # (1) masked low-rank weight (f32 Pallas kernel) vs einsum reference
    ref_wT = jnp.einsum("mnri,mni,mnor,mno->mio",
                        lr1_all, m1_all, lr2_all, m2_all)
    assert jnp.allclose(wT_all, ref_wT, atol=1e-4, rtol=1e-4)

    # (2) conv output: tight check against the same bf16-rounded operands with
    # f32 accumulation (matches the Pallas kernel's numerics), plus a loose
    # sanity check against the full-f32 reference.
    ref_weight = wT_all.reshape(KH, KW, IC, OC).transpose(3, 2, 0, 1)  # OIHW
    ph, pw = cfg["padding"]
    common = dict(window_strides=cfg["stride"],
                  padding=[(ph, ph), (pw, pw)],
                  rhs_dilation=cfg["dilation"],
                  dimension_numbers=("NCHW", "OIHW", "NCHW"),
                  feature_group_count=1)
    ref_bf16 = lax.conv_general_dilated(
        x.astype(jnp.bfloat16), ref_weight.astype(jnp.bfloat16),
        preferred_element_type=jnp.float32, **common) + bias[None, :, None, None]
    assert jnp.allclose(out, ref_bf16, atol=2e-3, rtol=2e-3)

    ref_f32 = lax.conv_general_dilated(x, ref_weight, **common) \
        + bias[None, :, None, None]
    assert jnp.allclose(out, ref_f32, atol=5e-2, rtol=5e-2)

    print("KERNEL_OK")
</pallas_src>

<mosaic_0001>
module attributes {stable_mosaic.version = 11 : i64} {
  func.func @masked_weight_kernel(%arg0: i32, %arg1: memref<1x4x4xf32, #tpu.memory_space<vmem>>, %arg2: memref<1x4x4xf32, #tpu.memory_space<vmem>>, %arg3: memref<1x4x8xf32, #tpu.memory_space<vmem>>, %arg4: memref<1x4x8xf32, #tpu.memory_space<vmem>>, %arg5: memref<1x4x8xf32, #tpu.memory_space<vmem>>) attributes {dimension_semantics = [#tpu.dimension_semantics<parallel>], iteration_bounds = array<i64: 9>, scalar_prefetch = 0 : i64, scratch_operands = 0 : i64, tpu.core_type = #tpu.core_type<tc>, window_params = [{transform_indices = @transform_0, window_bounds = array<i64: 1, 4, 4>}, {transform_indices = @transform_1, window_bounds = array<i64: 1, 4, 4>}, {transform_indices = @transform_2, window_bounds = array<i64: 1, 4, 8>}, {transform_indices = @transform_3, window_bounds = array<i64: 1, 4, 8>}, {transform_indices = @transform_4, window_bounds = array<i64: 1, 4, 8>}]} {
    %c0 = arith.constant 0 : index
    %c0_0 = arith.constant 0 : index
    %c0_1 = arith.constant 0 : index
    %0 = vector.load %arg1[%c0, %c0_0, %c0_1] : memref<1x4x4xf32, #tpu.memory_space<vmem>>, vector<1x4x4xf32>
    %1 = vector.shape_cast %0 : vector<1x4x4xf32> to vector<4x4xf32>
    %c0_2 = arith.constant 0 : index
    %c0_3 = arith.constant 0 : index
    %c0_4 = arith.constant 0 : index
    %2 = vector.load %arg2[%c0_2, %c0_3, %c0_4] : memref<1x4x4xf32, #tpu.memory_space<vmem>>, vector<1x4x4xf32>
    %3 = vector.shape_cast %2 : vector<1x4x4xf32> to vector<4x4xf32>
    %4 = arith.mulf %1, %3 : vector<4x4xf32>
    %c0_5 = arith.constant 0 : index
    %c0_6 = arith.constant 0 : index
    %c0_7 = arith.constant 0 : index
    %5 = vector.load %arg3[%c0_5, %c0_6, %c0_7] : memref<1x4x8xf32, #tpu.memory_space<vmem>>, vector<1x4x8xf32>
    %6 = vector.shape_cast %5 : vector<1x4x8xf32> to vector<4x8xf32>
    %c0_8 = arith.constant 0 : index
    %c0_9 = arith.constant 0 : index
    %c0_10 = arith.constant 0 : index
    %7 = vector.load %arg4[%c0_8, %c0_9, %c0_10] : memref<1x4x8xf32, #tpu.memory_space<vmem>>, vector<1x4x8xf32>
    %8 = vector.shape_cast %7 : vector<1x4x8xf32> to vector<4x8xf32>
    %9 = arith.mulf %6, %8 : vector<4x8xf32>
    %cst = arith.constant dense<0.000000e+00> : vector<4x8xf32>
    %10 = tpu.matmul %4, %9, %cst {dimension_numbers = #tpu.dot_dimension_numbers<[1], [0], [0], [1], [0, 0, 1, 1], [], []>} : vector<4x4xf32>, vector<4x8xf32>, vector<4x8xf32> -> vector<4x8xf32>
    %c0_11 = arith.constant 0 : index
    %c0_12 = arith.constant 0 : index
    %c0_13 = arith.constant 0 : index
    %11 = vector.load %arg5[%c0_11, %c0_12, %c0_13] : memref<1x4x8xf32, #tpu.memory_space<vmem>>, vector<1x4x8xf32>
    %12 = vector.shape_cast %11 : vector<1x4x8xf32> to vector<4x8xf32>
    %13 = vector.shape_cast %10 : vector<4x8xf32> to vector<1x4x8xf32>
    tpu.vector_store %arg5[%c0_11, %c0_12, %c0_13], %13 {strides = array<i32>} : memref<1x4x8xf32, #tpu.memory_space<vmem>>, vector<1x4x8xf32>,
    return
  }
  func.func @transform_0(%arg0: i32) -> (i32, i32, i32) {
    %c0_i32 = arith.constant 0 : i32
    %c0_i32_0 = arith.constant 0 : i32
    %c0_i32_1 = arith.constant 0 : i32
    return %arg0, %c0_i32, %c0_i32_0 : i32, i32, i32
  }
  func.func @transform_1(%arg0: i32) -> (i32, i32, i32) {
    %c0_i32 = arith.constant 0 : i32
    %c0_i32_0 = arith.constant 0 : i32
    %c0_i32_1 = arith.constant 0 : i32
    return %arg0, %c0_i32, %c0_i32_0 : i32, i32, i32
  }
  func.func @transform_2(%arg0: i32) -> (i32, i32, i32) {
    %c0_i32 = arith.constant 0 : i32
    %c0_i32_0 = arith.constant 0 : i32
    %c0_i32_1 = arith.constant 0 : i32
    return %arg0, %c0_i32, %c0_i32_0 : i32, i32, i32
  }
  func.func @transform_3(%arg0: i32) -> (i32, i32, i32) {
    %c0_i32 = arith.constant 0 : i32
    %c0_i32_0 = arith.constant 0 : i32
    %c0_i32_1 = arith.constant 0 : i32
    return %arg0, %c0_i32, %c0_i32_0 : i32, i32, i32
  }
  func.func @transform_4(%arg0: i32) -> (i32, i32, i32) {
    %c0_i32 = arith.constant 0 : i32
    %c0_i32_0 = arith.constant 0 : i32
    %c0_i32_1 = arith.constant 0 : i32
    return %arg0, %c0_i32, %c0_i32_0 : i32, i32, i32
  }
}

</mosaic_0001>

<bundles_post_ra>
// kernel: tpu_custom_call.1
= control target key start
LH: loop header
LB: loop body
LE: loop exit
PB: predicated region body
PF: predicated region fallthrough
CT: control target
= control target key end

     0   :  { %s424_s15 = smov 0   ;;  %s450_s0 = inlined_call_operand.vmem [shape: f32[9,4,4], index: 0, kind: input, shape index: {}]   ;;  %s451_s1 = inlined_call_operand.vmem [shape: f32[9,4,4], index: 1, kind: input, shape index: {}]   ;;  %s452_s2 = inlined_call_operand.vmem [shape: f32[9,4,8], index: 2, kind: input, shape index: {}]   ;;  %s453_s3 = inlined_call_operand.vmem [shape: f32[9,4,8], index: 3, kind: input, shape index: {}]   ;;  %s454_s4 = inlined_call_operand.vmem [shape: f32[9,4,8], index: 4, kind: output, shape index: {}]  }
   0x1 LB: > { %s369_s16 = sadd.s32 4294967295, %s397_s15   ;;  %p373_p0 = scmp.ge.s32.totalorder %s397_s15, 1  ;;  %s397_s15 = sphi %s424_s15, %s14_s15  }
   0x2   : > { %p188_p1 = scmp.lt.s32.totalorder %s397_s15, 10 }
   0x4   : > { %p189_p2 = pnand %p373_p0, %p188_p1 }
   0x5   : > { %p224_p3 = scmp.lt.s32.totalorder (!%p189_p2), %s369_s16, 8 }
   0x6   : > { %192 = sbr.rel (%p189_p2) target bundleno = 147 (0x93), region = 36 }
   0xb   : > { %s456_s16 = smov (!%p224_p3, %s369_s16), 8  ;;  %vm254_vm0 = vcmask 1043456   ;;  %vm250_vm1 = vcmask 31744   ;;  %vm278_vm2 = vcmask 60416  }
   0xc   : > { %s374_s17 = sshll.u32 %s456_s16, 2 }
   0xd   : > { %s235_s20 = scalar_lea.vmem %s452_s2, %s374_s17  ;;  %s239_s23 = scalar_lea.vmem %s453_s3, %s374_s17 }
   0xe   : > { %v247_v0 = vld [vmem:[%s235_s20] sm:$0xf]  ;;  %s227_s26 = scalar_lea.vmem %s450_s0, %s374_s17  ;;  %s231_s29 = scalar_lea.vmem %s451_s1, %s374_s17 }
   0xf   : > { %v248_v1 = vld [vmem:[%s239_s23] sm:$0xf]  ;;  %s243_s6 = scalar_lea.vmem %s454_s4, %s374_s17 }
  0x10   : > { %v249_v2 = vmul.f32 %v248_v1, %v247_v0  ;;  %v244_v3 = vld [vmem:[%s227_s26] sm:$0xf] }
  0x11   : > { %v245_v4 = vld [vmem:[%s231_s29] sm:$0xf] }
  0x12   : > { %v246_v5 = vmul.f32 %v245_v4, %v244_v3  ;;  %379 = vmatpush.msk.msra.mxu0 %vm254_vm0, %v249_v2 }
  0x14   : > { %380 = vmatmul.msk.f32.vlgmr.msra.gmra.mxu0 %vm250_vm1, %v246_v5 }
  0x91   : > { %v275_v6 = vpop.f32.mrf.mxu0 }
  0x92   : > { %279 = vst.msk [vmem:[%s243_s6] sm:$0xf] %vm278_vm2, %v275_v6 }
  0x93 PF: > { %s14_s15 = sadd.s32 1, %s397_s15  }
  0x94   : > { %p11_p4 = scmp.ge.s32.totalorder %s14_s15, 11  }
  0x96   :  { %13 = sbr.rel (!%p11_p4) target bundleno = 1 (0x1), region = 75 }

</bundles_post_ra>
